<compile_context>
chip_gen: v5e
topology: v5e:2x2
jax: 0.10.0
libtpu: 0.0.40
codegen_flags: <defaults>
</compile_context>

<pallas_src>
import functools

import jax
import jax.numpy as jnp
from jax.experimental import pallas as pl
from jax.experimental.pallas import tpu as pltpu


def _lstm_intensity_kernel(x_ref, wih_ref, whh_ref, b_ref, wlin_ref, blin_ref,
                           out_ref, *, seq_len, batch):
    """x_ref: (S*B, E) f32, rows ordered (t, b).
    wih_ref: (E, 4H) bf16 and whh_ref: (H, 4H) bf16 with the i/f/o column
      blocks pre-scaled by 0.5 (sigmoid-via-tanh trick).
    b_ref: (1, 4H) f32 = b_ih + b_hh with the same pre-scaling.
    wlin_ref: (1, H) f32, blin_ref: (1, 1) f32.  out_ref: (B, 1) f32."""
    H = whh_ref.shape[0]
    S, B = seq_len, batch

    # Input projection for ALL timesteps/sequences in one MXU matmul.  The
    # bf16 cast of x lives here (VPU op, hides under the MXU), not the wrapper.
    x_bf16 = x_ref[...].astype(jnp.bfloat16)                        # (S*B, E)
    gates_x = (jnp.dot(x_bf16, wih_ref[...],
                       preferred_element_type=jnp.float32)
               + b_ref[...])                                        # (S*B, 4H) f32

    # Pre-extract per-step blocks: no dependence on h/c, so keep the sublane
    # extracts off the serial recurrence chain.
    gx = [gates_x[t * B:(t + 1) * B, :] for t in range(S)]          # each (B, 4H)

    h = jnp.zeros((B, H), jnp.float32)
    c = jnp.zeros((B, H), jnp.float32)

    whh = whh_ref[...]                                              # (H, 4H) bf16
    # Fully unrolled recurrence: only the (B,H)@(H,4H) matmul and one tanh sit
    # on the serial dependency chain per step.
    # TODO(synk): keep W_hh resident in MXU weight registers across the S steps
    # via pltpu.matmul_push_rhs / matmul_acc_lhs / matmul_pop.
    for t in range(S):
        gates = gx[t] + jnp.dot(h.astype(jnp.bfloat16), whh,
                                preferred_element_type=jnp.float32)  # (B, 4H)
        # One EUP pass covers all four gates: i/f/o blocks were pre-scaled by
        # 1/2, so sigmoid(z) = 0.5 + 0.5*tanh(z/2); the g block is plain tanh(z).
        tg = jnp.tanh(gates)
        i_g = 0.5 + 0.5 * tg[:, 0:H]
        f_g = 0.5 + 0.5 * tg[:, H:2 * H]
        g_g = tg[:, 2 * H:3 * H]
        o_g = 0.5 + 0.5 * tg[:, 3 * H:4 * H]
        c = f_g * c + i_g * g_g
        h = o_g * jnp.tanh(c)

    # Final Linear(H, 1): VPU multiply + lane reduce (no 1-lane MXU matmul).
    out_ref[...] = (jnp.sum(h * wlin_ref[...], axis=-1, keepdims=True)
                    + blin_ref[...])


def prepare_params(w_ih, w_hh, b_ih, b_hh, w_lin, b_lin):
    """One-time (init-time) weight transform; call ONCE and reuse the result so
    per-forward device work is just the single pallas_call.

    PyTorch conventions: w_ih (4H,E), w_hh (4H,H), b_ih/b_hh (4H,),
    w_lin (1,H), b_lin (1,).  Gate order [i, f, g, o]."""
    H4 = w_ih.shape[0]
    H = H4 // 4
    # Fold the 1/2 of sigmoid(z) = 0.5 + 0.5*tanh(z/2) into the i/f/o column
    # blocks of the transposed weights and the folded bias (g block untouched).
    col_scale = jnp.concatenate([jnp.full((H,), 0.5, jnp.float32),
                                 jnp.full((H,), 0.5, jnp.float32),
                                 jnp.ones((H,), jnp.float32),
                                 jnp.full((H,), 0.5, jnp.float32)])            # (4H,)
    wih_t = (jnp.asarray(w_ih, jnp.float32).T * col_scale).astype(jnp.bfloat16)  # (E, 4H)
    whh_t = (jnp.asarray(w_hh, jnp.float32).T * col_scale).astype(jnp.bfloat16)  # (H, 4H)
    bias = ((jnp.asarray(b_ih, jnp.float32) + jnp.asarray(b_hh, jnp.float32))
            * col_scale).reshape(1, H4)                                          # (1, 4H) f32
    wlin_row = jnp.asarray(w_lin, jnp.float32).reshape(1, H)                     # (1, H)
    blin = jnp.asarray(b_lin, jnp.float32).reshape(1, 1)                         # (1, 1)
    return wih_t, whh_t, bias, wlin_row, blin


@jax.jit
def lstm_intensity_forward(x, wih_t, whh_t, bias, wlin_row, blin):
    """x: (S, B, E) f32 (seq-first, like the PyTorch module); params from
    prepare_params().  Zero-init hidden/cell per sequence (init_hidden).
    Returns (B, 1); B=1 is the module's exact configuration."""
    S, B, E = x.shape
    x2d = jnp.asarray(x, jnp.float32).reshape(S * B, E)   # contiguous, free under jit

    kernel = functools.partial(_lstm_intensity_kernel, seq_len=S, batch=B)
    vmem = pl.BlockSpec(memory_space=pltpu.MemorySpace.VMEM)
    # Whole problem (a few KiB for these shapes) lives in VMEM in one gridless
    # invocation.
    # TODO(synk): for very large B, tile the batch with a grid axis marked
    # "parallel" (uses v7x's second TensorCore) and size tiles for 64 MiB VMEM.
    out = pl.pallas_call(
        kernel,
        out_shape=jax.ShapeDtypeStruct((B, 1), jnp.float32),
        in_specs=[vmem] * 6,
        out_specs=vmem,
    )(x2d, wih_t, whh_t, bias, wlin_row, blin)
    return out


def _reference_forward(x, w_ih, w_hh, b_ih, b_hh, w_lin, b_lin):
    """Pure-JAX f32 reference of the PyTorch module forward (zero-init h/c)."""
    S, B, E = x.shape
    H = w_hh.shape[1]
    h = jnp.zeros((B, H), jnp.float32)
    c = jnp.zeros((B, H), jnp.float32)
    for t in range(S):
        gates = x[t] @ w_ih.T + b_ih + h @ w_hh.T + b_hh
        i = jax.nn.sigmoid(gates[:, 0:H])
        f = jax.nn.sigmoid(gates[:, H:2 * H])
        g = jnp.tanh(gates[:, 2 * H:3 * H])
        o = jax.nn.sigmoid(gates[:, 3 * H:4 * H])
        c = f * c + i * g
        h = o * jnp.tanh(c)
    return h @ w_lin.T + b_lin


if __name__ == "__main__":
    # Shapes implied by the module: seq-first input, seq=8, E=16 features, H=32.
    S, E, H = 8, 16, 32

    key = jax.random.PRNGKey(0)
    ks = jax.random.split(key, 8)
    scale = 0.1
    w_ih = scale * jax.random.normal(ks[0], (4 * H, E), jnp.float32)
    w_hh = scale * jax.random.normal(ks[1], (4 * H, H), jnp.float32)
    b_ih = scale * jax.random.normal(ks[2], (4 * H,), jnp.float32)
    b_hh = scale * jax.random.normal(ks[3], (4 * H,), jnp.float32)
    w_lin = scale * jax.random.normal(ks[4], (1, H), jnp.float32)
    b_lin = scale * jax.random.normal(ks[5], (1,), jnp.float32)

    # One-time weight prep (hoisted out of the per-call path).
    params = jax.block_until_ready(
        prepare_params(w_ih, w_hh, b_ih, b_hh, w_lin, b_lin))

    # Case 1: the module's exact configuration (batch = 1, init_hidden(1)).
    x1 = jax.random.normal(ks[6], (S, 1, E), jnp.float32)
    out1 = jax.block_until_ready(lstm_intensity_forward(x1, *params))
    ref1 = _reference_forward(x1, w_ih, w_hh, b_ih, b_hh, w_lin, b_lin)
    assert out1.shape == (1, 1)
    assert jnp.allclose(out1, ref1, atol=2e-2, rtol=2e-2), (out1, ref1)

    # Case 2: batched M dimension (independent sequences, zero-init h/c each)
    # -- the throughput path recommended by the performance review.
    B = 8
    xb = jax.random.normal(ks[7], (S, B, E), jnp.float32)
    outb = jax.block_until_ready(lstm_intensity_forward(xb, *params))
    refb = _reference_forward(xb, w_ih, w_hh, b_ih, b_hh, w_lin, b_lin)
    assert outb.shape == (B, 1)
    assert jnp.allclose(outb, refb, atol=2e-2, rtol=2e-2), (outb, refb)

    print("KERNEL_OK")
</pallas_src>

<mosaic_0001>
module attributes {stable_mosaic.version = 11 : i64} {
  func.func @_lstm_intensity_kernel(%arg0: memref<8x16xf32, #tpu.memory_space<vmem>>, %arg1: memref<16x128xbf16, #tpu.memory_space<vmem>>, %arg2: memref<32x128xbf16, #tpu.memory_space<vmem>>, %arg3: memref<1x128xf32, #tpu.memory_space<vmem>>, %arg4: memref<1x32xf32, #tpu.memory_space<vmem>>, %arg5: memref<1x1xf32, #tpu.memory_space<vmem>>, %arg6: memref<1x1xf32, #tpu.memory_space<vmem>>) attributes {dimension_semantics = [], scalar_prefetch = 0 : i64, scratch_operands = 0 : i64, tpu.core_type = #tpu.core_type<tc>} {
    %c0 = arith.constant 0 : index
    %c0_0 = arith.constant 0 : index
    %0 = vector.load %arg0[%c0, %c0_0] : memref<8x16xf32, #tpu.memory_space<vmem>>, vector<8x16xf32>
    %1 = arith.truncf %0 : vector<8x16xf32> to vector<8x16xbf16>
    %c0_1 = arith.constant 0 : index
    %c0_2 = arith.constant 0 : index
    %2 = vector.load %arg1[%c0_1, %c0_2] : memref<16x128xbf16, #tpu.memory_space<vmem>>, vector<16x128xbf16>
    %cst = arith.constant dense<0.000000e+00> : vector<8x128xf32>
    %3 = tpu.matmul %1, %2, %cst {dimension_numbers = #tpu.dot_dimension_numbers<[1], [0], [0], [1], [0, 0, 1, 1], [], []>} : vector<8x16xbf16>, vector<16x128xbf16>, vector<8x128xf32> -> vector<8x128xf32>
    %c0_3 = arith.constant 0 : index
    %c0_4 = arith.constant 0 : index
    %4 = vector.load %arg3[%c0_3, %c0_4] : memref<1x128xf32, #tpu.memory_space<vmem>>, vector<1x128xf32>
    %5 = vector.broadcast %4 : vector<1x128xf32> to vector<8x128xf32>
    %6 = arith.addf %3, %5 : vector<8x128xf32>
    %7 = vector.extract_strided_slice %6 {offsets = [0, 0], sizes = [1, 128], strides = [1, 1]} : vector<8x128xf32> to vector<1x128xf32>
    %8 = vector.extract_strided_slice %6 {offsets = [1, 0], sizes = [1, 128], strides = [1, 1]} : vector<8x128xf32> to vector<1x128xf32>
    %9 = vector.extract_strided_slice %6 {offsets = [2, 0], sizes = [1, 128], strides = [1, 1]} : vector<8x128xf32> to vector<1x128xf32>
    %10 = vector.extract_strided_slice %6 {offsets = [3, 0], sizes = [1, 128], strides = [1, 1]} : vector<8x128xf32> to vector<1x128xf32>
    %11 = vector.extract_strided_slice %6 {offsets = [4, 0], sizes = [1, 128], strides = [1, 1]} : vector<8x128xf32> to vector<1x128xf32>
    %12 = vector.extract_strided_slice %6 {offsets = [5, 0], sizes = [1, 128], strides = [1, 1]} : vector<8x128xf32> to vector<1x128xf32>
    %13 = vector.extract_strided_slice %6 {offsets = [6, 0], sizes = [1, 128], strides = [1, 1]} : vector<8x128xf32> to vector<1x128xf32>
    %14 = vector.extract_strided_slice %6 {offsets = [7, 0], sizes = [1, 128], strides = [1, 1]} : vector<8x128xf32> to vector<1x128xf32>
    %cst_5 = arith.constant 0.000000e+00 : f32
    %15 = vector.broadcast %cst_5 : f32 to vector<1x32xf32>
    %cst_6 = arith.constant 0.000000e+00 : f32
    %16 = vector.broadcast %cst_6 : f32 to vector<1x32xf32>
    %c0_7 = arith.constant 0 : index
    %c0_8 = arith.constant 0 : index
    %17 = vector.load %arg2[%c0_7, %c0_8] : memref<32x128xbf16, #tpu.memory_space<vmem>>, vector<32x128xbf16>
    %18 = arith.truncf %15 : vector<1x32xf32> to vector<1x32xbf16>
    %cst_9 = arith.constant dense<0.000000e+00> : vector<1x128xf32>
    %19 = tpu.matmul %18, %17, %cst_9 {dimension_numbers = #tpu.dot_dimension_numbers<[1], [0], [0], [1], [0, 0, 1, 1], [], []>} : vector<1x32xbf16>, vector<32x128xbf16>, vector<1x128xf32> -> vector<1x128xf32>
    %20 = arith.addf %7, %19 : vector<1x128xf32>
    %21 = math.tanh %20 : vector<1x128xf32>
    %22 = vector.extract_strided_slice %21 {offsets = [0, 0], sizes = [1, 32], strides = [1, 1]} : vector<1x128xf32> to vector<1x32xf32>
    %cst_10 = arith.constant 5.000000e-01 : f32
    %23 = vector.broadcast %cst_10 : f32 to vector<1x32xf32>
    %24 = arith.mulf %23, %22 : vector<1x32xf32>
    %cst_11 = arith.constant 5.000000e-01 : f32
    %25 = vector.broadcast %cst_11 : f32 to vector<1x32xf32>
    %26 = arith.addf %25, %24 : vector<1x32xf32>
    %27 = vector.extract_strided_slice %21 {offsets = [0, 32], sizes = [1, 32], strides = [1, 1]} : vector<1x128xf32> to vector<1x32xf32>
    %cst_12 = arith.constant 5.000000e-01 : f32
    %28 = vector.broadcast %cst_12 : f32 to vector<1x32xf32>
    %29 = arith.mulf %28, %27 : vector<1x32xf32>
    %cst_13 = arith.constant 5.000000e-01 : f32
    %30 = vector.broadcast %cst_13 : f32 to vector<1x32xf32>
    %31 = arith.addf %30, %29 : vector<1x32xf32>
    %32 = vector.extract_strided_slice %21 {offsets = [0, 64], sizes = [1, 32], strides = [1, 1]} : vector<1x128xf32> to vector<1x32xf32>
    %33 = vector.extract_strided_slice %21 {offsets = [0, 96], sizes = [1, 32], strides = [1, 1]} : vector<1x128xf32> to vector<1x32xf32>
    %cst_14 = arith.constant 5.000000e-01 : f32
    %34 = vector.broadcast %cst_14 : f32 to vector<1x32xf32>
    %35 = arith.mulf %34, %33 : vector<1x32xf32>
    %cst_15 = arith.constant 5.000000e-01 : f32
    %36 = vector.broadcast %cst_15 : f32 to vector<1x32xf32>
    %37 = arith.addf %36, %35 : vector<1x32xf32>
    %38 = arith.mulf %31, %16 : vector<1x32xf32>
    %39 = arith.mulf %26, %32 : vector<1x32xf32>
    %40 = arith.addf %38, %39 : vector<1x32xf32>
    %41 = math.tanh %40 : vector<1x32xf32>
    %42 = arith.mulf %37, %41 : vector<1x32xf32>
    %43 = arith.truncf %42 : vector<1x32xf32> to vector<1x32xbf16>
    %cst_16 = arith.constant dense<0.000000e+00> : vector<1x128xf32>
    %44 = tpu.matmul %43, %17, %cst_16 {dimension_numbers = #tpu.dot_dimension_numbers<[1], [0], [0], [1], [0, 0, 1, 1], [], []>} : vector<1x32xbf16>, vector<32x128xbf16>, vector<1x128xf32> -> vector<1x128xf32>
    %45 = arith.addf %8, %44 : vector<1x128xf32>
    %46 = math.tanh %45 : vector<1x128xf32>
    %47 = vector.extract_strided_slice %46 {offsets = [0, 0], sizes = [1, 32], strides = [1, 1]} : vector<1x128xf32> to vector<1x32xf32>
    %cst_17 = arith.constant 5.000000e-01 : f32
    %48 = vector.broadcast %cst_17 : f32 to vector<1x32xf32>
    %49 = arith.mulf %48, %47 : vector<1x32xf32>
    %cst_18 = arith.constant 5.000000e-01 : f32
    %50 = vector.broadcast %cst_18 : f32 to vector<1x32xf32>
    %51 = arith.addf %50, %49 : vector<1x32xf32>
    %52 = vector.extract_strided_slice %46 {offsets = [0, 32], sizes = [1, 32], strides = [1, 1]} : vector<1x128xf32> to vector<1x32xf32>
    %cst_19 = arith.constant 5.000000e-01 : f32
    %53 = vector.broadcast %cst_19 : f32 to vector<1x32xf32>
    %54 = arith.mulf %53, %52 : vector<1x32xf32>
    %cst_20 = arith.constant 5.000000e-01 : f32
    %55 = vector.broadcast %cst_20 : f32 to vector<1x32xf32>
    %56 = arith.addf %55, %54 : vector<1x32xf32>
    %57 = vector.extract_strided_slice %46 {offsets = [0, 64], sizes = [1, 32], strides = [1, 1]} : vector<1x128xf32> to vector<1x32xf32>
    %58 = vector.extract_strided_slice %46 {offsets = [0, 96], sizes = [1, 32], strides = [1, 1]} : vector<1x128xf32> to vector<1x32xf32>
    %cst_21 = arith.constant 5.000000e-01 : f32
    %59 = vector.broadcast %cst_21 : f32 to vector<1x32xf32>
    %60 = arith.mulf %59, %58 : vector<1x32xf32>
    %cst_22 = arith.constant 5.000000e-01 : f32
    %61 = vector.broadcast %cst_22 : f32 to vector<1x32xf32>
    %62 = arith.addf %61, %60 : vector<1x32xf32>
    %63 = arith.mulf %56, %40 : vector<1x32xf32>
    %64 = arith.mulf %51, %57 : vector<1x32xf32>
    %65 = arith.addf %63, %64 : vector<1x32xf32>
    %66 = math.tanh %65 : vector<1x32xf32>
    %67 = arith.mulf %62, %66 : vector<1x32xf32>
    %68 = arith.truncf %67 : vector<1x32xf32> to vector<1x32xbf16>
    %cst_23 = arith.constant dense<0.000000e+00> : vector<1x128xf32>
    %69 = tpu.matmul %68, %17, %cst_23 {dimension_numbers = #tpu.dot_dimension_numbers<[1], [0], [0], [1], [0, 0, 1, 1], [], []>} : vector<1x32xbf16>, vector<32x128xbf16>, vector<1x128xf32> -> vector<1x128xf32>
    %70 = arith.addf %9, %69 : vector<1x128xf32>
    %71 = math.tanh %70 : vector<1x128xf32>
    %72 = vector.extract_strided_slice %71 {offsets = [0, 0], sizes = [1, 32], strides = [1, 1]} : vector<1x128xf32> to vector<1x32xf32>
    %cst_24 = arith.constant 5.000000e-01 : f32
    %73 = vector.broadcast %cst_24 : f32 to vector<1x32xf32>
    %74 = arith.mulf %73, %72 : vector<1x32xf32>
    %cst_25 = arith.constant 5.000000e-01 : f32
    %75 = vector.broadcast %cst_25 : f32 to vector<1x32xf32>
    %76 = arith.addf %75, %74 : vector<1x32xf32>
    %77 = vector.extract_strided_slice %71 {offsets = [0, 32], sizes = [1, 32], strides = [1, 1]} : vector<1x128xf32> to vector<1x32xf32>
    %cst_26 = arith.constant 5.000000e-01 : f32
    %78 = vector.broadcast %cst_26 : f32 to vector<1x32xf32>
    %79 = arith.mulf %78, %77 : vector<1x32xf32>
    %cst_27 = arith.constant 5.000000e-01 : f32
    %80 = vector.broadcast %cst_27 : f32 to vector<1x32xf32>
    %81 = arith.addf %80, %79 : vector<1x32xf32>
    %82 = vector.extract_strided_slice %71 {offsets = [0, 64], sizes = [1, 32], strides = [1, 1]} : vector<1x128xf32> to vector<1x32xf32>
    %83 = vector.extract_strided_slice %71 {offsets = [0, 96], sizes = [1, 32], strides = [1, 1]} : vector<1x128xf32> to vector<1x32xf32>
    %cst_28 = arith.constant 5.000000e-01 : f32
    %84 = vector.broadcast %cst_28 : f32 to vector<1x32xf32>
    %85 = arith.mulf %84, %83 : vector<1x32xf32>
    %cst_29 = arith.constant 5.000000e-01 : f32
    %86 = vector.broadcast %cst_29 : f32 to vector<1x32xf32>
    %87 = arith.addf %86, %85 : vector<1x32xf32>
    %88 = arith.mulf %81, %65 : vector<1x32xf32>
    %89 = arith.mulf %76, %82 : vector<1x32xf32>
    %90 = arith.addf %88, %89 : vector<1x32xf32>
    %91 = math.tanh %90 : vector<1x32xf32>
    %92 = arith.mulf %87, %91 : vector<1x32xf32>
    %93 = arith.truncf %92 : vector<1x32xf32> to vector<1x32xbf16>
    %cst_30 = arith.constant dense<0.000000e+00> : vector<1x128xf32>
    %94 = tpu.matmul %93, %17, %cst_30 {dimension_numbers = #tpu.dot_dimension_numbers<[1], [0], [0], [1], [0, 0, 1, 1], [], []>} : vector<1x32xbf16>, vector<32x128xbf16>, vector<1x128xf32> -> vector<1x128xf32>
    %95 = arith.addf %10, %94 : vector<1x128xf32>
    %96 = math.tanh %95 : vector<1x128xf32>
    %97 = vector.extract_strided_slice %96 {offsets = [0, 0], sizes = [1, 32], strides = [1, 1]} : vector<1x128xf32> to vector<1x32xf32>
    %cst_31 = arith.constant 5.000000e-01 : f32
    %98 = vector.broadcast %cst_31 : f32 to vector<1x32xf32>
    %99 = arith.mulf %98, %97 : vector<1x32xf32>
    %cst_32 = arith.constant 5.000000e-01 : f32
    %100 = vector.broadcast %cst_32 : f32 to vector<1x32xf32>
    %101 = arith.addf %100, %99 : vector<1x32xf32>
    %102 = vector.extract_strided_slice %96 {offsets = [0, 32], sizes = [1, 32], strides = [1, 1]} : vector<1x128xf32> to vector<1x32xf32>
    %cst_33 = arith.constant 5.000000e-01 : f32
    %103 = vector.broadcast %cst_33 : f32 to vector<1x32xf32>
    %104 = arith.mulf %103, %102 : vector<1x32xf32>
    %cst_34 = arith.constant 5.000000e-01 : f32
    %105 = vector.broadcast %cst_34 : f32 to vector<1x32xf32>
    %106 = arith.addf %105, %104 : vector<1x32xf32>
    %107 = vector.extract_strided_slice %96 {offsets = [0, 64], sizes = [1, 32], strides = [1, 1]} : vector<1x128xf32> to vector<1x32xf32>
    %108 = vector.extract_strided_slice %96 {offsets = [0, 96], sizes = [1, 32], strides = [1, 1]} : vector<1x128xf32> to vector<1x32xf32>
    %cst_35 = arith.constant 5.000000e-01 : f32
    %109 = vector.broadcast %cst_35 : f32 to vector<1x32xf32>
    %110 = arith.mulf %109, %108 : vector<1x32xf32>
    %cst_36 = arith.constant 5.000000e-01 : f32
    %111 = vector.broadcast %cst_36 : f32 to vector<1x32xf32>
    %112 = arith.addf %111, %110 : vector<1x32xf32>
    %113 = arith.mulf %106, %90 : vector<1x32xf32>
    %114 = arith.mulf %101, %107 : vector<1x32xf32>
    %115 = arith.addf %113, %114 : vector<1x32xf32>
    %116 = math.tanh %115 : vector<1x32xf32>
    %117 = arith.mulf %112, %116 : vector<1x32xf32>
    %118 = arith.truncf %117 : vector<1x32xf32> to vector<1x32xbf16>
    %cst_37 = arith.constant dense<0.000000e+00> : vector<1x128xf32>
    %119 = tpu.matmul %118, %17, %cst_37 {dimension_numbers = #tpu.dot_dimension_numbers<[1], [0], [0], [1], [0, 0, 1, 1], [], []>} : vector<1x32xbf16>, vector<32x128xbf16>, vector<1x128xf32> -> vector<1x128xf32>
    %120 = arith.addf %11, %119 : vector<1x128xf32>
    %121 = math.tanh %120 : vector<1x128xf32>
    %122 = vector.extract_strided_slice %121 {offsets = [0, 0], sizes = [1, 32], strides = [1, 1]} : vector<1x128xf32> to vector<1x32xf32>
    %cst_38 = arith.constant 5.000000e-01 : f32
    %123 = vector.broadcast %cst_38 : f32 to vector<1x32xf32>
    %124 = arith.mulf %123, %122 : vector<1x32xf32>
    %cst_39 = arith.constant 5.000000e-01 : f32
    %125 = vector.broadcast %cst_39 : f32 to vector<1x32xf32>
    %126 = arith.addf %125, %124 : vector<1x32xf32>
    %127 = vector.extract_strided_slice %121 {offsets = [0, 32], sizes = [1, 32], strides = [1, 1]} : vector<1x128xf32> to vector<1x32xf32>
    %cst_40 = arith.constant 5.000000e-01 : f32
    %128 = vector.broadcast %cst_40 : f32 to vector<1x32xf32>
    %129 = arith.mulf %128, %127 : vector<1x32xf32>
    %cst_41 = arith.constant 5.000000e-01 : f32
    %130 = vector.broadcast %cst_41 : f32 to vector<1x32xf32>
    %131 = arith.addf %130, %129 : vector<1x32xf32>
    %132 = vector.extract_strided_slice %121 {offsets = [0, 64], sizes = [1, 32], strides = [1, 1]} : vector<1x128xf32> to vector<1x32xf32>
    %133 = vector.extract_strided_slice %121 {offsets = [0, 96], sizes = [1, 32], strides = [1, 1]} : vector<1x128xf32> to vector<1x32xf32>
    %cst_42 = arith.constant 5.000000e-01 : f32
    %134 = vector.broadcast %cst_42 : f32 to vector<1x32xf32>
    %135 = arith.mulf %134, %133 : vector<1x32xf32>
    %cst_43 = arith.constant 5.000000e-01 : f32
    %136 = vector.broadcast %cst_43 : f32 to vector<1x32xf32>
    %137 = arith.addf %136, %135 : vector<1x32xf32>
    %138 = arith.mulf %131, %115 : vector<1x32xf32>
    %139 = arith.mulf %126, %132 : vector<1x32xf32>
    %140 = arith.addf %138, %139 : vector<1x32xf32>
    %141 = math.tanh %140 : vector<1x32xf32>
    %142 = arith.mulf %137, %141 : vector<1x32xf32>
    %143 = arith.truncf %142 : vector<1x32xf32> to vector<1x32xbf16>
    %cst_44 = arith.constant dense<0.000000e+00> : vector<1x128xf32>
    %144 = tpu.matmul %143, %17, %cst_44 {dimension_numbers = #tpu.dot_dimension_numbers<[1], [0], [0], [1], [0, 0, 1, 1], [], []>} : vector<1x32xbf16>, vector<32x128xbf16>, vector<1x128xf32> -> vector<1x128xf32>
    %145 = arith.addf %12, %144 : vector<1x128xf32>
    %146 = math.tanh %145 : vector<1x128xf32>
    %147 = vector.extract_strided_slice %146 {offsets = [0, 0], sizes = [1, 32], strides = [1, 1]} : vector<1x128xf32> to vector<1x32xf32>
    %cst_45 = arith.constant 5.000000e-01 : f32
    %148 = vector.broadcast %cst_45 : f32 to vector<1x32xf32>
    %149 = arith.mulf %148, %147 : vector<1x32xf32>
    %cst_46 = arith.constant 5.000000e-01 : f32
    %150 = vector.broadcast %cst_46 : f32 to vector<1x32xf32>
    %151 = arith.addf %150, %149 : vector<1x32xf32>
    %152 = vector.extract_strided_slice %146 {offsets = [0, 32], sizes = [1, 32], strides = [1, 1]} : vector<1x128xf32> to vector<1x32xf32>
    %cst_47 = arith.constant 5.000000e-01 : f32
    %153 = vector.broadcast %cst_47 : f32 to vector<1x32xf32>
    %154 = arith.mulf %153, %152 : vector<1x32xf32>
    %cst_48 = arith.constant 5.000000e-01 : f32
    %155 = vector.broadcast %cst_48 : f32 to vector<1x32xf32>
    %156 = arith.addf %155, %154 : vector<1x32xf32>
    %157 = vector.extract_strided_slice %146 {offsets = [0, 64], sizes = [1, 32], strides = [1, 1]} : vector<1x128xf32> to vector<1x32xf32>
    %158 = vector.extract_strided_slice %146 {offsets = [0, 96], sizes = [1, 32], strides = [1, 1]} : vector<1x128xf32> to vector<1x32xf32>
    %cst_49 = arith.constant 5.000000e-01 : f32
    %159 = vector.broadcast %cst_49 : f32 to vector<1x32xf32>
    %160 = arith.mulf %159, %158 : vector<1x32xf32>
    %cst_50 = arith.constant 5.000000e-01 : f32
    %161 = vector.broadcast %cst_50 : f32 to vector<1x32xf32>
    %162 = arith.addf %161, %160 : vector<1x32xf32>
    %163 = arith.mulf %156, %140 : vector<1x32xf32>
    %164 = arith.mulf %151, %157 : vector<1x32xf32>
    %165 = arith.addf %163, %164 : vector<1x32xf32>
    %166 = math.tanh %165 : vector<1x32xf32>
    %167 = arith.mulf %162, %166 : vector<1x32xf32>
    %168 = arith.truncf %167 : vector<1x32xf32> to vector<1x32xbf16>
    %cst_51 = arith.constant dense<0.000000e+00> : vector<1x128xf32>
    %169 = tpu.matmul %168, %17, %cst_51 {dimension_numbers = #tpu.dot_dimension_numbers<[1], [0], [0], [1], [0, 0, 1, 1], [], []>} : vector<1x32xbf16>, vector<32x128xbf16>, vector<1x128xf32> -> vector<1x128xf32>
    %170 = arith.addf %13, %169 : vector<1x128xf32>
    %171 = math.tanh %170 : vector<1x128xf32>
    %172 = vector.extract_strided_slice %171 {offsets = [0, 0], sizes = [1, 32], strides = [1, 1]} : vector<1x128xf32> to vector<1x32xf32>
    %cst_52 = arith.constant 5.000000e-01 : f32
    %173 = vector.broadcast %cst_52 : f32 to vector<1x32xf32>
    %174 = arith.mulf %173, %172 : vector<1x32xf32>
    %cst_53 = arith.constant 5.000000e-01 : f32
    %175 = vector.broadcast %cst_53 : f32 to vector<1x32xf32>
    %176 = arith.addf %175, %174 : vector<1x32xf32>
    %177 = vector.extract_strided_slice %171 {offsets = [0, 32], sizes = [1, 32], strides = [1, 1]} : vector<1x128xf32> to vector<1x32xf32>
    %cst_54 = arith.constant 5.000000e-01 : f32
    %178 = vector.broadcast %cst_54 : f32 to vector<1x32xf32>
    %179 = arith.mulf %178, %177 : vector<1x32xf32>
    %cst_55 = arith.constant 5.000000e-01 : f32
    %180 = vector.broadcast %cst_55 : f32 to vector<1x32xf32>
    %181 = arith.addf %180, %179 : vector<1x32xf32>
    %182 = vector.extract_strided_slice %171 {offsets = [0, 64], sizes = [1, 32], strides = [1, 1]} : vector<1x128xf32> to vector<1x32xf32>
    %183 = vector.extract_strided_slice %171 {offsets = [0, 96], sizes = [1, 32], strides = [1, 1]} : vector<1x128xf32> to vector<1x32xf32>
    %cst_56 = arith.constant 5.000000e-01 : f32
    %184 = vector.broadcast %cst_56 : f32 to vector<1x32xf32>
    %185 = arith.mulf %184, %183 : vector<1x32xf32>
    %cst_57 = arith.constant 5.000000e-01 : f32
    %186 = vector.broadcast %cst_57 : f32 to vector<1x32xf32>
    %187 = arith.addf %186, %185 : vector<1x32xf32>
    %188 = arith.mulf %181, %165 : vector<1x32xf32>
    %189 = arith.mulf %176, %182 : vector<1x32xf32>
    %190 = arith.addf %188, %189 : vector<1x32xf32>
    %191 = math.tanh %190 : vector<1x32xf32>
    %192 = arith.mulf %187, %191 : vector<1x32xf32>
    %193 = arith.truncf %192 : vector<1x32xf32> to vector<1x32xbf16>
    %cst_58 = arith.constant dense<0.000000e+00> : vector<1x128xf32>
    %194 = tpu.matmul %193, %17, %cst_58 {dimension_numbers = #tpu.dot_dimension_numbers<[1], [0], [0], [1], [0, 0, 1, 1], [], []>} : vector<1x32xbf16>, vector<32x128xbf16>, vector<1x128xf32> -> vector<1x128xf32>
    %195 = arith.addf %14, %194 : vector<1x128xf32>
    %196 = math.tanh %195 : vector<1x128xf32>
    %197 = vector.extract_strided_slice %196 {offsets = [0, 0], sizes = [1, 32], strides = [1, 1]} : vector<1x128xf32> to vector<1x32xf32>
    %cst_59 = arith.constant 5.000000e-01 : f32
    %198 = vector.broadcast %cst_59 : f32 to vector<1x32xf32>
    %199 = arith.mulf %198, %197 : vector<1x32xf32>
    %cst_60 = arith.constant 5.000000e-01 : f32
    %200 = vector.broadcast %cst_60 : f32 to vector<1x32xf32>
    %201 = arith.addf %200, %199 : vector<1x32xf32>
    %202 = vector.extract_strided_slice %196 {offsets = [0, 32], sizes = [1, 32], strides = [1, 1]} : vector<1x128xf32> to vector<1x32xf32>
    %cst_61 = arith.constant 5.000000e-01 : f32
    %203 = vector.broadcast %cst_61 : f32 to vector<1x32xf32>
    %204 = arith.mulf %203, %202 : vector<1x32xf32>
    %cst_62 = arith.constant 5.000000e-01 : f32
    %205 = vector.broadcast %cst_62 : f32 to vector<1x32xf32>
    %206 = arith.addf %205, %204 : vector<1x32xf32>
    %207 = vector.extract_strided_slice %196 {offsets = [0, 64], sizes = [1, 32], strides = [1, 1]} : vector<1x128xf32> to vector<1x32xf32>
    %208 = vector.extract_strided_slice %196 {offsets = [0, 96], sizes = [1, 32], strides = [1, 1]} : vector<1x128xf32> to vector<1x32xf32>
    %cst_63 = arith.constant 5.000000e-01 : f32
    %209 = vector.broadcast %cst_63 : f32 to vector<1x32xf32>
    %210 = arith.mulf %209, %208 : vector<1x32xf32>
    %cst_64 = arith.constant 5.000000e-01 : f32
    %211 = vector.broadcast %cst_64 : f32 to vector<1x32xf32>
    %212 = arith.addf %211, %210 : vector<1x32xf32>
    %213 = arith.mulf %206, %190 : vector<1x32xf32>
    %214 = arith.mulf %201, %207 : vector<1x32xf32>
    %215 = arith.addf %213, %214 : vector<1x32xf32>
    %216 = math.tanh %215 : vector<1x32xf32>
    %217 = arith.mulf %212, %216 : vector<1x32xf32>
    %c0_65 = arith.constant 0 : index
    %c0_66 = arith.constant 0 : index
    %218 = vector.load %arg4[%c0_65, %c0_66] : memref<1x32xf32, #tpu.memory_space<vmem>>, vector<1x32xf32>
    %219 = arith.mulf %217, %218 : vector<1x32xf32>
    %cst_67 = arith.constant dense<0.000000e+00> : vector<1xf32>
    %220 = vector.multi_reduction <add>, %219, %cst_67 [1] : vector<1x32xf32> to vector<1xf32>
    %221 = vector.shape_cast %220 : vector<1xf32> to vector<1x1xf32>
    %c0_68 = arith.constant 0 : index
    %c0_69 = arith.constant 0 : index
    %222 = vector.load %arg5[%c0_68, %c0_69] : memref<1x1xf32, #tpu.memory_space<vmem>>, vector<1x1xf32>
    %223 = arith.addf %221, %222 : vector<1x1xf32>
    %c0_70 = arith.constant 0 : index
    %c0_71 = arith.constant 0 : index
    %224 = vector.load %arg6[%c0_70, %c0_71] : memref<1x1xf32, #tpu.memory_space<vmem>>, vector<1x1xf32>
    tpu.vector_store %arg6[%c0_70, %c0_71], %223 {strides = array<i32>} : memref<1x1xf32, #tpu.memory_space<vmem>>, vector<1x1xf32>,
    return
  }
}

</mosaic_0001>

<bundles_post_ra>
// kernel: lstm_intensity_forward.1
= control target key start
LH: loop header
LB: loop body
LE: loop exit
PB: predicated region body
PF: predicated region fallthrough
CT: control target
= control target key end

     0   :  { %s824_s0 = inlined_call_operand.hbm [shape: f32[8,16], index: 0, kind: input, shape index: {}]   ;;  %s825_s1 = inlined_call_operand.hbm [shape: bf16[16,128], index: 1, kind: input, shape index: {}]   ;;  %s826_s2 = inlined_call_operand.hbm [shape: bf16[32,128], index: 2, kind: input, shape index: {}]   ;;  %s827_s3 = inlined_call_operand.vmem [shape: f32[1,128], index: 3, kind: input, shape index: {}]   ;;  %s828_s4 = inlined_call_operand.vmem [shape: f32[1,32], index: 4, kind: input, shape index: {}]   ;;  %s829_s5 = inlined_call_operand.<no memory space> [shape: f32[1,1], index: 5, kind: input, shape index: {}]   ;;  %s830_s6 = inlined_call_operand.hbm [shape: f32[1,1], index: 6, kind: output, shape index: {}]  }
   0x1   :  { %v11_v0 = vstv %s829_s5 }
   0x2   :  { %12 = vst [vmem:[#allocation2] sm:$0x1] %v11_v0 }
   0x3   :  { %13 = vsyncpa [#allocation4], 0 }
   0x4   :  { %14 = vsyncpa [#allocation7], 0  ;;  %s31_s25 = sshll.u32 %s825_s1, 4  ;;  %s32_s25 = int_to_ptr.hbm [resolvable:$true] %s31_s25 }
   0x5   :  { %15 = vsyncpa [#allocation5], 0  ;;  %s706_s26 = smov [#allocation6]   ;;  %s21_s30 = sshll.u32 %s824_s0, 4  ;;  %s22_s30 = int_to_ptr.hbm [resolvable:$true] %s21_s30 }
   0x6   :  { %s33_s27 = sshll.u32 %s706_s26, 4  ;;  %s707_s7 = smov 64   ;;  %s34_s27 = int_to_ptr.vmem [resolvable:$true] %s33_s27 }
   0x7   :  { %s708_s8 = smov 4   ;;  %s709_s5 = smov [#allocation3]  }
   0x8   :  { %39 = dma.hbm_to_vmem [thread:$0]  %s32_s25, 128, %s34_s27, [#allocation7], %s707_s7, %s707_s7, %s708_s8  }
   0x9   :  { %s23_s9 = sshll.u32 %s709_s5, 4  ;;  %s44_s1 = sshll.u32 %s826_s2, 4  ;;  %s24_s9 = int_to_ptr.vmem [resolvable:$true] %s23_s9  ;;  %s45_s1 = int_to_ptr.hbm [resolvable:$true] %s44_s1 }
   0xa   :  { %26 = dma.hbm_to_vmem [thread:$0]  %s22_s30, 128, %s24_s9, [#allocation4]  }
   0xb   :  { %s710_s12 = smov [#allocation8]  }
   0xc   :  { %s46_s13 = sshll.u32 %s710_s12, 4  ;;  %s47_s13 = int_to_ptr.vmem [resolvable:$true] %s46_s13 }
   0xd   :  { %52 = dma.hbm_to_vmem [thread:$0]  %s45_s1, 256, %s47_s13, [#allocation7], %s707_s7, %s707_s7, %s708_s8  }
   0xe   :  { %700 = dma.done.wait [#allocation4], 128  }
   0xf   :  { %701 = vsyncadd [#allocation4], 4294967168 }
  0x10   :  { %702 = dma.done.wait [#allocation7], 384  }
  0x11   :  { %703 = vsyncadd [#allocation7], 4294966912  ;;  %v557_v1 = vld [vmem:[#allocation6] sm:$0xff]  ;;  %v559_v2 = vld [vmem:[#allocation8 + $0x8] sm:$0xff]  ;;  %vm86_vm0 = vcmask 130048   ;;  %v711_v6 = vmov 0  }
  0x12   :  { %v72_v3 = vld [vmem:[#allocation3] sm:$0xff]  ;;  %97 = vmatpush.bf16.msra.mxu0 %v557_v1  ;;  %129 = vmatpush.bf16.msra.mxu1 %v559_v2  ;;  %v558_v5 = vld [vmem:[#allocation8] sm:$0xff]  ;;  %v569_v7 = vld [vmem:[%s827_s3] ss:$0 sm:$0xff]  ;;  %s712_s14 = smov 32   ;;  %vm119_vm1 = vcmask 261120  }
  0x13   :  { %v73_v4 = vpack.c.bf16 %v72_v3, %v72_v3  ;;  %170 = vmatpush.bf16.msra.mxu2 %v559_v2  ;;  %219 = vmatpush.bf16.msra.mxu3 %v559_v2  ;;  %s713_s16 = smov 96   ;;  %vm508_vm2 = vcmask 261127   ;;  %s526_s20 = sshll.u32 %s830_s6, 4  ;;  %vm517_vm3 = vcmask 7175   ;;  %s527_s20 = int_to_ptr.hbm [resolvable:$true] %s526_s20 }
  0x15   :  { %541 = vmatmul.msk.bf16.vlgmr.msra.gmra.mxu0 %vm86_vm0, %v73_v4 }
  0x16   :  { %267 = vmatpush.bf16.msrb.mxu0 %v559_v2  ;;  %130 = vmatpush.bf16.msra.mxu1 %v558_v5 }
  0x17   :  { %171 = vmatpush.bf16.msra.mxu2 %v558_v5  ;;  %220 = vmatpush.bf16.msra.mxu3 %v558_v5 }
  0x19   :  { %131 = vmatmul.bf16.vlgmr.msra.gmra.mxu1 %v711_v6 }
  0x1a   :  { %268 = vmatpush.bf16.msrb.mxu0 %v558_v5  ;;  %317 = vmatpush.bf16.msrb.mxu1 %v559_v2 }
  0x1b   :  { %365 = vmatpush.bf16.msrb.mxu2 %v559_v2  ;;  %415 = vmatpush.bf16.msrb.mxu3 %v559_v2 }
  0x1e   :  { %463 = vmatpush.bf16.msra.mxu0 %v559_v2  ;;  %318 = vmatpush.bf16.msrb.mxu1 %v558_v5 }
  0x1f   :  { %366 = vmatpush.bf16.msrb.mxu2 %v558_v5  ;;  %416 = vmatpush.bf16.msrb.mxu3 %v558_v5 }
  0x22   :  { %464 = vmatpush.bf16.msra.mxu0 %v558_v5 }
  0x92   :  { %v99_v8 = vpop.f32.mrf.mxu0 }
  0x93   :  { %v769_v9 = vadd.f32 %v569_v7, %v99_v8 }
  0x96   :  { %v132_v10 = vpop.f32.mrf.mxu1 }
  0x97   :  { %v136_v11 = vadd.f32 %v132_v10, %v769_v9 }
  0x99   :  { %572 = vtanh.f32 %v136_v11 }
  0x9a   :  { %v101_v12 = vpop.f32.mrf.mxu0 }
  0x9e   :  { %v134_v13 = vpop.f32.mrf.mxu1 }
  0x9f   :  { %v573_v14 = vpop.eup %572 }
  0xa0   :  { %142 = vrot.lane.b32.xlu0 %v573_v14, %s707_s7  ;;  %v138_v15 = vmul.f32 0.5, %v573_v14 }
  0xa2   :  { %v139_v16 = vadd.f32 0.5, %v138_v15 }
  0xa4   :  { %v140_v19 = vmul.f32 0.0, %v139_v16 }
 0x112   :  { %v143_v17 = vpop.permute.xlu0 %142 }
 0x113   :  { %v145_v18 = vmul.f32 %v143_v17, %v139_v16 }
 0x115   :  { %147 = vrot.lane.b32.xlu0 %v145_v18, %s712_s14 }
 0x187   :  { %v148_v20 = vpop.permute.xlu0 %147 }
 0x188   :  { %v150_v21 = vadd.f32 %v148_v20, %v140_v19 }
 0x18a   :  { %574 = vtanh.f32 %v150_v21  ;;  %v185_v36 = vrot.slane %v150_v21, 7 }
 0x190   :  { %v575_v22 = vpop.eup %574 }
 0x191   :  { %153 = vrot.lane.b32.xlu1 %v575_v22, %s707_s7 }
 0x203   :  { %v154_v23 = vpop.permute.xlu1 %153 }
 0x204   :  { %v156_v24 = vmul.f32 %v154_v23, %v139_v16 }
 0x206   :  { %v157_v25 = vpack.c.bf16 %v156_v24, %v156_v24 }
 0x208   :  { %159 = vrot.lane.b32.xlu1 %v157_v25, %s712_s14 }
 0x27a   :  { %v160_v26 = vpop.permute.xlu1 %159 }
 0x27b   :  { %550 = vmatmul.msk.bf16.vlgmr.msra.gmra.mxu2 %vm119_vm1, %v160_v26 }
 0x2fe   :  { %v173_v27 = vpop.f32.mrf.mxu2 }
 0x2ff   :  { %v178_v28 = vrot.slane %v173_v27, 7 }
 0x301   :  { %v180_v29 = vadd.f32 %v178_v28, %v769_v9 }
 0x303   :  { %576 = vtanh.f32 %v180_v29 }
 0x306   :  { %v175_v30 = vpop.f32.mrf.mxu2 }
 0x309   :  { %v577_v31 = vpop.eup %576 }
 0x30a   :  { %189 = vrot.lane.b32.xlu2 %v577_v31, %s707_s7  ;;  %v182_v32 = vmul.f32 0.5, %v577_v31 }
 0x30c   :  { %v183_v33 = vadd.f32 0.5, %v182_v32 }
 0x30e   :  { %v187_v37 = vmul.f32 %v185_v36, %v183_v33 }
 0x364   :  { %v190_v34 = vpop.permute.xlu2 %189 }
 0x365   :  { %v192_v35 = vmul.f32 %v190_v34, %v183_v33 }
 0x367   :  { %194 = vrot.lane.b32.xlu2 %v192_v35, %s712_s14 }
 0x3c1   :  { %v195_v38 = vpop.permute.xlu2 %194 }
 0x3c2   :  { %v197_v39 = vadd.f32 %v195_v38, %v187_v37 }
 0x3c4   :  { %578 = vtanh.f32 %v197_v39  ;;  %v234_v55 = vrot.slane %v197_v39, 7 }
 0x3ca   :  { %v579_v40 = vpop.eup %578 }
 0x3cb   :  { %200 = vrot.lane.b32.xlu0 %v579_v40, %s707_s7 }
 0x43d   :  { %v201_v41 = vpop.permute.xlu0 %200 }
 0x43e   :  { %v203_v42 = vmul.f32 %v201_v41, %v183_v33 }
 0x440   :  { %v204_v43 = vpack.c.bf16 %v203_v42, %v203_v42 }
 0x442   :  { %v206_v44 = vshrl.u32 %v204_v43, 16 }
 0x444   :  { %208 = vrot.lane.b32.xlu1 %v206_v44, %s712_s14 }
 0x4b6   :  { %v209_v45 = vpop.permute.xlu1 %208 }
 0x4b7   :  { %551 = vmatmul.msk.bf16.vlgmr.msra.gmra.mxu3 %vm119_vm1, %v209_v45 }
 0x53a   :  { %v222_v46 = vpop.f32.mrf.mxu3 }
 0x53b   :  { %v227_v47 = vrot.slane %v222_v46, 6 }
 0x53d   :  { %v229_v48 = vadd.f32 %v227_v47, %v769_v9 }
 0x53f   :  { %580 = vtanh.f32 %v229_v48 }
 0x542   :  { %v224_v49 = vpop.f32.mrf.mxu3 }
 0x545   :  { %v581_v50 = vpop.eup %580 }
 0x546   :  { %238 = vrot.lane.b32.xlu2 %v581_v50, %s707_s7  ;;  %v231_v51 = vmul.f32 0.5, %v581_v50 }
 0x548   :  { %v232_v52 = vadd.f32 0.5, %v231_v51 }
 0x54a   :  { %v236_v56 = vmul.f32 %v234_v55, %v232_v52 }
 0x5a0   :  { %v239_v53 = vpop.permute.xlu2 %238 }
 0x5a1   :  { %v241_v54 = vmul.f32 %v239_v53, %v232_v52 }
 0x5a3   :  { %243 = vrot.lane.b32.xlu0 %v241_v54, %s712_s14 }
 0x615   :  { %v244_v57 = vpop.permute.xlu0 %243 }
 0x616   :  { %v246_v58 = vadd.f32 %v244_v57, %v236_v56 }
 0x618   :  { %582 = vtanh.f32 %v246_v58  ;;  %v282_v11 = vrot.slane %v246_v58, 7 }
 0x61e   :  { %v583_v59 = vpop.eup %582 }
 0x61f   :  { %249 = vrot.lane.b32.xlu1 %v583_v59, %s707_s7 }
 0x691   :  { %v250_v60 = vpop.permute.xlu1 %249 }
 0x692   :  { %v252_v61 = vmul.f32 %v250_v60, %v232_v52 }
 0x694   :  { %v253_v62 = vpack.c.bf16 %v252_v61, %v252_v61 }
 0x696   :  { %v255_v63 = vrot.slane %v253_v62, 1 }
 0x698   :  { %256 = vrot.lane.b32.xlu2 %v255_v63, %s712_s14 }
 0x6f2   :  { %v257_v0 = vpop.permute.xlu2 %256 }
 0x6f3   :  { %552 = vmatmul.msk.bf16.vlgmr.msrb.gmra.mxu0 %vm119_vm1, %v257_v0 }
 0x770   :  { %v270_v1 = vpop.f32.mrf.mxu0 }
 0x771   :  { %v275_v2 = vrot.slane %v270_v1, 5 }
 0x773   :  { %v277_v3 = vadd.f32 %v275_v2, %v769_v9 }
 0x775   :  { %584 = vtanh.f32 %v277_v3 }
 0x778   :  { %v272_v4 = vpop.f32.mrf.mxu0 }
 0x77b   :  { %v585_v5 = vpop.eup %584 }
 0x77c   :  { %286 = vrot.lane.b32.xlu0 %v585_v5, %s707_s7  ;;  %v279_v6 = vmul.f32 0.5, %v585_v5 }
 0x77e   :  { %v280_v7 = vadd.f32 0.5, %v279_v6 }
 0x780   :  { %v284_v12 = vmul.f32 %v282_v11, %v280_v7 }
 0x7ee   :  { %v287_v8 = vpop.permute.xlu0 %286 }
 0x7ef   :  { %v289_v10 = vmul.f32 %v287_v8, %v280_v7 }
 0x7f1   :  { %291 = vrot.lane.b32.xlu1 %v289_v10, %s712_s14 }
 0x863   :  { %v292_v13 = vpop.permute.xlu1 %291 }
 0x864   :  { %v294_v14 = vadd.f32 %v292_v13, %v284_v12 }
 0x866   :  { %586 = vtanh.f32 %v294_v14  ;;  %v332_v31 = vrot.slane %v294_v14, 7 }
 0x86c   :  { %v587_v15 = vpop.eup %586 }
 0x86d   :  { %297 = vrot.lane.b32.xlu2 %v587_v15, %s707_s7 }
 0x8c7   :  { %v298_v16 = vpop.permute.xlu2 %297 }
 0x8c8   :  { %v300_v17 = vmul.f32 %v298_v16, %v280_v7 }
 0x8ca   :  { %v301_v18 = vpack.c.bf16 %v300_v17, %v300_v17 }
 0x8cc   :  { %v303_v19 = vshrl.u32 %v301_v18, 16 }
 0x8ce   :  { %v305_v20 = vrot.slane %v303_v19, 1 }
 0x8d0   :  { %306 = vrot.lane.b32.xlu0 %v305_v20, %s712_s14 }
 0x942   :  { %v307_v21 = vpop.permute.xlu0 %306 }
 0x943   :  { %553 = vmatmul.msk.bf16.vlgmr.msrb.gmra.mxu1 %vm119_vm1, %v307_v21 }
 0x9c0   :  { %v320_v22 = vpop.f32.mrf.mxu1 }
 0x9c1   :  { %v325_v23 = vrot.slane %v320_v22, 4 }
 0x9c3   :  { %v327_v24 = vadd.f32 %v325_v23, %v769_v9 }
 0x9c5   :  { %588 = vtanh.f32 %v327_v24 }
 0x9c8   :  { %v322_v25 = vpop.f32.mrf.mxu1 }
 0x9cb   :  { %v589_v26 = vpop.eup %588 }
 0x9cc   :  { %336 = vrot.lane.b32.xlu1 %v589_v26, %s707_s7  ;;  %v329_v27 = vmul.f32 0.5, %v589_v26  ;;  %v570_v26 = vld [vmem:[%s828_s4] ss:$0 sm:$0xff]  ;;  %s714_s4 = smov [#allocation9]  }
 0x9cd   :  { %s524_s17 = sshll.u32 %s714_s4, 4  ;;  %s525_s17 = int_to_ptr.vmem [resolvable:$true] %s524_s17 }
 0x9ce   :  { %v330_v28 = vadd.f32 0.5, %v329_v27 }
 0x9d0   :  { %v334_v32 = vmul.f32 %v332_v31, %v330_v28 }
 0xa3e   :  { %v337_v29 = vpop.permute.xlu1 %336 }
 0xa3f   :  { %v339_v30 = vmul.f32 %v337_v29, %v330_v28 }
 0xa41   :  { %341 = vrot.lane.b32.xlu2 %v339_v30, %s712_s14 }
 0xa9b   :  { %v342_v33 = vpop.permute.xlu2 %341 }
 0xa9c   :  { %v344_v34 = vadd.f32 %v342_v33, %v334_v32 }
 0xa9e   :  { %590 = vtanh.f32 %v344_v34  ;;  %v380_v50 = vrot.slane %v344_v34, 7 }
 0xaa4   :  { %v591_v35 = vpop.eup %590 }
 0xaa5   :  { %347 = vrot.lane.b32.xlu0 %v591_v35, %s707_s7 }
 0xb17   :  { %v348_v36 = vpop.permute.xlu0 %347 }
 0xb18   :  { %v350_v37 = vmul.f32 %v348_v36, %v330_v28 }
 0xb1a   :  { %v351_v38 = vpack.c.bf16 %v350_v37, %v350_v37  ;;  %v571_v37 = vld [vmem:[#allocation2] ss:$0 sm:$0xff] }
 0xb1c   :  { %v353_v39 = vrot.slane %v351_v38, 2 }
 0xb1e   :  { %354 = vrot.lane.b32.xlu1 %v353_v39, %s712_s14 }
 0xb90   :  { %v355_v40 = vpop.permute.xlu1 %354 }
 0xb91   :  { %554 = vmatmul.msk.bf16.vlgmr.msrb.gmra.mxu2 %vm119_vm1, %v355_v40 }
 0xc14   :  { %v368_v41 = vpop.f32.mrf.mxu2 }
 0xc15   :  { %v373_v42 = vrot.slane %v368_v41, 3 }
 0xc17   :  { %v375_v43 = vadd.f32 %v373_v42, %v769_v9 }
 0xc19   :  { %592 = vtanh.f32 %v375_v43 }
 0xc1c   :  { %v370_v44 = vpop.f32.mrf.mxu2 }
 0xc1f   :  { %v593_v45 = vpop.eup %592 }
 0xc20   :  { %384 = vrot.lane.b32.xlu2 %v593_v45, %s707_s7  ;;  %v377_v46 = vmul.f32 0.5, %v593_v45 }
 0xc22   :  { %v378_v47 = vadd.f32 0.5, %v377_v46 }
 0xc24   :  { %v382_v51 = vmul.f32 %v380_v50, %v378_v47 }
 0xc7a   :  { %v385_v48 = vpop.permute.xlu2 %384 }
 0xc7b   :  { %v387_v49 = vmul.f32 %v385_v48, %v378_v47 }
 0xc7d   :  { %389 = vrot.lane.b32.xlu0 %v387_v49, %s712_s14 }
 0xcef   :  { %v390_v52 = vpop.permute.xlu0 %389 }
 0xcf0   :  { %v392_v53 = vadd.f32 %v390_v52, %v382_v51 }
 0xcf2   :  { %594 = vtanh.f32 %v392_v53  ;;  %v430_v6 = vrot.slane %v392_v53, 7 }
 0xcf8   :  { %v595_v54 = vpop.eup %594 }
 0xcf9   :  { %395 = vrot.lane.b32.xlu1 %v595_v54, %s707_s7 }
 0xd6b   :  { %v396_v55 = vpop.permute.xlu1 %395 }
 0xd6c   :  { %v398_v56 = vmul.f32 %v396_v55, %v378_v47 }
 0xd6e   :  { %v399_v57 = vpack.c.bf16 %v398_v56, %v398_v56 }
 0xd70   :  { %v401_v58 = vshrl.u32 %v399_v57, 16 }
 0xd72   :  { %v403_v59 = vrot.slane %v401_v58, 2 }
 0xd74   :  { %404 = vrot.lane.b32.xlu2 %v403_v59, %s712_s14 }
 0xdce   :  { %v405_v60 = vpop.permute.xlu2 %404 }
 0xdcf   :  { %555 = vmatmul.msk.bf16.vlgmr.msrb.gmra.mxu3 %vm119_vm1, %v405_v60 }
 0xe52   :  { %v418_v61 = vpop.f32.mrf.mxu3 }
 0xe53   :  { %v423_v62 = vrot.slane %v418_v61, 2 }
 0xe55   :  { %v425_v63 = vadd.f32 %v423_v62, %v769_v9 }
 0xe57   :  { %596 = vtanh.f32 %v425_v63 }
 0xe5a   :  { %v420_v0 = vpop.f32.mrf.mxu3 }
 0xe5d   :  { %v597_v1 = vpop.eup %596 }
 0xe5e   :  { %434 = vrot.lane.b32.xlu0 %v597_v1, %s707_s7  ;;  %v427_v2 = vmul.f32 0.5, %v597_v1 }
 0xe60   :  { %v428_v3 = vadd.f32 0.5, %v427_v2 }
 0xe62   :  { %v432_v7 = vmul.f32 %v430_v6, %v428_v3 }
 0xed0   :  { %v435_v4 = vpop.permute.xlu0 %434 }
 0xed1   :  { %v437_v5 = vmul.f32 %v435_v4, %v428_v3 }
 0xed3   :  { %439 = vrot.lane.b32.xlu1 %v437_v5, %s712_s14 }
 0xf45   :  { %v440_v8 = vpop.permute.xlu1 %439 }
 0xf46   :  { %v442_v10 = vadd.f32 %v440_v8, %v432_v7 }
 0xf48   :  { %598 = vtanh.f32 %v442_v10  ;;  %v478_v27 = vrot.slane %v442_v10, 7 }
 0xf4e   :  { %v599_v11 = vpop.eup %598 }
 0xf4f   :  { %445 = vrot.lane.b32.xlu2 %v599_v11, %s707_s7 }
 0xfa9   :  { %v446_v12 = vpop.permute.xlu2 %445 }
 0xfaa   :  { %v448_v13 = vmul.f32 %v446_v12, %v428_v3 }
 0xfac   :  { %v449_v14 = vpack.c.bf16 %v448_v13, %v448_v13 }
 0xfae   :  { %v451_v15 = vrot.slane %v449_v14, 3 }
 0xfb0   :  { %452 = vrot.lane.b32.xlu0 %v451_v15, %s712_s14 }
0x1022   :  { %v453_v16 = vpop.permute.xlu0 %452 }
0x1023   :  { %556 = vmatmul.msk.bf16.vlgmr.msra.gmra.mxu0 %vm119_vm1, %v453_v16 }
0x10a0   :  { %v466_v17 = vpop.f32.mrf.mxu0 }
0x10a1   :  { %v471_v18 = vrot.slane %v466_v17, 1 }
0x10a3   :  { %v473_v19 = vadd.f32 %v471_v18, %v769_v9 }
0x10a5   :  { %600 = vtanh.f32 %v473_v19 }
0x10a8   :  { %v468_v20 = vpop.f32.mrf.mxu0 }
0x10ab   :  { %v601_v21 = vpop.eup %600 }
0x10ac   :  { %482 = vrot.lane.b32.xlu1 %v601_v21, %s707_s7  ;;  %v475_v22 = vmul.f32 0.5, %v601_v21 }
0x10ae   :  { %v476_v23 = vadd.f32 0.5, %v475_v22 }
0x10b0   :  { %v480_v28 = vmul.f32 %v478_v27, %v476_v23 }
0x10b4   :  { %500 = vrot.lane.b32.xlu1 %v570_v26, %s713_s16 }
0x111e   :  { %v483_v24 = vpop.permute.xlu1 %482 }
0x111f   :  { %v485_v25 = vmul.f32 %v483_v24, %v476_v23 }
0x1121   :  { %487 = vrot.lane.b32.xlu2 %v485_v25, %s712_s14 }
0x1126   :  { %v501_v32 = vpop.permute.xlu1 %500 }
0x117b   :  { %v488_v9 = vpop.permute.xlu2 %487 }
0x117c   :  { %v490_v29 = vadd.f32 %v488_v9, %v480_v28 }
0x117e   :  { %602 = vtanh.f32 %v490_v29 }
0x1184   :  { %v603_v30 = vpop.eup %602 }
0x1185   :  { %493 = vrot.lane.b32.xlu0 %v603_v30, %s707_s7 }
0x11f7   :  { %v494_v31 = vpop.permute.xlu0 %493 }
0x11f8   :  { %v496_v33 = vmul.f32 %v494_v31, %v476_v23 }
0x11fa   :  { %v503_v34 = vmul.f32 %v501_v32, %v496_v33 }
0x11fc   :  { %505 = vrot.lane.b32.xlu2 %v503_v34, %s712_s14 }
0x1256   :  { %v506_v35 = vpop.permute.xlu2 %505 }
0x1257   :  { %v509_v36 = vsel %vm508_vm2, %v506_v35, 0.0 }
0x1258   :  { %510 = vadd.xlane.f32.xlu0 %v509_v36 }
0x12cb   :  { %v511_v38 = vpop.xlane.xlu0 %510 }
0x12cc   :  { %v516_v39 = vadd.f32 %v571_v37, %v511_v38 }
0x12ce   :  { %518 = vst.msk [vmem:[#allocation9 - $0x7] sm:$0x80] %vm517_vm3, %v516_v39 }
0x12cf   :  { %529 = dma.vmem_to_hbm [thread:$0]  %s525_s17, 16, %s527_s20, [#allocation5]  }
0x12d0   :  { %704 = dma.done.wait [#allocation5], 16  }
0x12d1   :  { %705 = vsyncadd [#allocation5], 4294967280 }
0x12d2   :  { %534 = vsyncpa [#allocation4], 1 }
0x12d3   :  { %535 = vsyncpa [#allocation7], 1 }
0x12d4   :  { %536 = vsyncpa [#allocation5], 1 }

</bundles_post_ra>
